<compile_context>
chip_gen: v6e
topology: v6e:2x2x1
jax: 0.10.0
libtpu: 0.0.40
codegen_flags: <defaults>
</compile_context>

<pallas_src>
import functools
import math

import jax
import jax.numpy as jnp
from jax import lax
from jax.experimental import pallas as pl
from jax.experimental.pallas import tpu as pltpu


NEG_BIG = -1e30  # finite "minus infinity" sentinel


def _round_up(x, m):
    return ((x + m - 1) // m) * m


def _vmem_limit_bytes():
    # ~3/4 of physical VMEM, capped at 96 MiB: 96 MiB on v5e/v6e (128 MiB
    # physical), 48 MiB on v7x (64 MiB physical -> leave Mosaic headroom).
    try:
        cap = int(pltpu.get_tpu_info().vmem_capacity_bytes)
    except Exception:
        cap = 128 * 1024 * 1024
    return min(96 * 1024 * 1024, (cap * 3) // 4)


# ----------------------------------------------------------------------------
# Tiled linear kernel:  o = x @ W^T + b   (W kept in PyTorch (Dout, Din) layout)
# ----------------------------------------------------------------------------
def _linear_kernel(x_ref, w_ref, b_ref, o_ref, acc_ref):
    @pl.when(pl.program_id(2) == 0)
    def _init():
        acc_ref[...] = jnp.zeros_like(acc_ref)

    # Contract over Din directly; no wt = w.T materialization in HBM.
    acc_ref[...] += lax.dot_general(
        x_ref[...], w_ref[...], (((1,), (1,)), ((), ())),
        preferred_element_type=jnp.float32)

    @pl.when(pl.program_id(2) == pl.num_programs(2) - 1)
    def _finalize():
        o_ref[...] = (acc_ref[...] + b_ref[...]).astype(o_ref.dtype)


def pallas_linear(x, w, b, *, out_dtype=jnp.float32, tm=256, tn=512, tk=1024):
    """x: (M, Din), w: (Dout, Din), b: (Dout,) -> (M, Dout).
    Operands are used at their own dtype (cast once in the wrapper for bf16
    mode); accumulation is always f32."""
    m, k = x.shape
    n = w.shape[0]

    tm_ = min(tm, _round_up(m, 8))
    tk_ = min(tk, _round_up(k, 128))
    tn_ = min(tn, _round_up(n, 128))
    mp, kp, np_ = _round_up(m, tm_), _round_up(k, tk_), _round_up(n, tn_)

    if (mp, kp) != (m, k):
        x = jnp.pad(x, ((0, mp - m), (0, kp - k)))
    if (np_, kp) != (n, k):
        w = jnp.pad(w, ((0, np_ - n), (0, kp - k)))
    b2 = b.reshape(1, n).astype(jnp.float32)
    if np_ != n:
        b2 = jnp.pad(b2, ((0, 0), (0, np_ - n)))

    grid = (mp // tm_, np_ // tn_, kp // tk_)
    out = pl.pallas_call(
        _linear_kernel,
        out_shape=jax.ShapeDtypeStruct((mp, np_), out_dtype),
        grid=grid,
        in_specs=[
            pl.BlockSpec((tm_, tk_), lambda i, j, kk: (i, kk)),
            pl.BlockSpec((tn_, tk_), lambda i, j, kk: (j, kk)),
            pl.BlockSpec((1, tn_), lambda i, j, kk: (0, j)),
        ],
        out_specs=pl.BlockSpec((tm_, tn_), lambda i, j, kk: (i, j)),
        scratch_shapes=[pltpu.VMEM((tm_, tn_), jnp.float32)],
        compiler_params=pltpu.CompilerParams(
            dimension_semantics=("parallel", "parallel", "arbitrary"),
            vmem_limit_bytes=_vmem_limit_bytes(),
        ),
    )(x, w, b2)
    return out[:m, :n]


# ----------------------------------------------------------------------------
# Head-major KV-tiled MLA attention core (absorbed form, online softmax)
# ----------------------------------------------------------------------------
def _mla_attn_kernel(offs_ref, q_ref, lk_ref, lv_ref, mask_ref, o_ref,
                     m_scr, l_scr, acc_scr, *, scale, is_causal,
                     q_block, kv_block, approx_recip):
    kv_idx = pl.program_id(2)
    q_start = pl.program_id(1) * q_block
    kv_start = kv_idx * kv_block

    @pl.when(kv_idx == 0)
    def _init():
        m_scr[...] = jnp.full_like(m_scr, NEG_BIG)
        l_scr[...] = jnp.zeros_like(l_scr)
        acc_scr[...] = jnp.zeros_like(acc_scr)

    q = q_ref[0]          # (qb, L)   head-major: no lane slicing per head
    lk = lk_ref[0]        # (kvb, L)
    lv = lv_ref[0]        # (kvb, L)

    def scores():
        s = lax.dot_general(q, lk, (((1,), (1,)), ((), ())),
                            preferred_element_type=jnp.float32) * scale
        pad = mask_ref[0]                                     # (1, kvb) int32
        return s + jnp.where(pad != 0, jnp.float32(NEG_BIG), jnp.float32(0.0))

    def online_update(s):
        m_prev = m_scr[...]
        m_new = jnp.maximum(m_prev, jnp.max(s, axis=-1, keepdims=True))
        alpha = jnp.exp(m_prev - m_new)
        p = jnp.exp(s - m_new)                                # f32 (v5e-safe)
        l_scr[...] = alpha * l_scr[...] + jnp.sum(p, axis=-1, keepdims=True)
        acc_scr[...] = alpha * acc_scr[...] + jnp.dot(
            p.astype(lv.dtype), lv, preferred_element_type=jnp.float32)
        m_scr[...] = m_new

    if is_causal:
        q_first = q_start + offs_ref[0]       # global position of first query
        q_last = q_first + q_block - 1
        kv_last = kv_start + kv_block - 1

        @pl.when(kv_last <= q_first)
        def _fully_visible():                 # below diagonal: no causal iota
            online_update(scores())

        @pl.when((kv_start <= q_last) & (kv_last > q_first))
        def _diagonal_block():                # straddles the diagonal
            row = q_first + lax.broadcasted_iota(
                jnp.int32, (q_block, kv_block), 0)
            col = kv_start + lax.broadcasted_iota(
                jnp.int32, (q_block, kv_block), 1)
            s = scores() + jnp.where(col > row, jnp.float32(NEG_BIG),
                                     jnp.float32(0.0))
            online_update(s)
        # kv_start > q_last: fully above the diagonal -> compute skipped, and
        # the clamped index_map already avoided streaming a new K/V block.
    else:
        online_update(scores())

    @pl.when(kv_idx == pl.num_programs(2) - 1)
    def _finalize():
        inv_l = pl.reciprocal(l_scr[...], approx=approx_recip)
        # Single lane-dense store of the whole (qb, L) tile (no per-head slices).
        o_ref[0] = (acc_scr[...] * inv_l).astype(o_ref.dtype)


def pallas_mla_attention_core(q_hm, lk_hm, lv_hm, mask_i32, causal_offset, *,
                              num_heads, scale, is_causal,
                              q_block=256, kv_block=512):
    """q_hm: (B*H, Sq, L), lk_hm/lv_hm: (B*H, Sk, L), mask_i32: (B, 1, Sk)
    with 1 = masked.  Returns normalized weighted latents (B*H, Sq, L)."""
    BH, Sq, L = q_hm.shape
    Sk = lk_hm.shape[1]
    H = num_heads

    qb = max(8, (min(q_block, _round_up(Sq, 8)) // 8) * 8)
    if _round_up(Sk, 8) <= kv_block:
        kvb = _round_up(Sk, 8)                       # single kv block
    else:
        kvb = max(128, (kv_block // 128) * 128)      # lane-aligned multi-block
    sqp, skp = _round_up(Sq, qb), _round_up(Sk, kvb)

    if sqp != Sq:
        q_hm = jnp.pad(q_hm, ((0, 0), (0, sqp - Sq), (0, 0)))
    if skp != Sk:
        lk_hm = jnp.pad(lk_hm, ((0, 0), (0, skp - Sk), (0, 0)))
        lv_hm = jnp.pad(lv_hm, ((0, 0), (0, skp - Sk), (0, 0)))
        mask_i32 = jnp.pad(mask_i32, ((0, 0), (0, 0), (0, skp - Sk)),
                           constant_values=1)        # padded keys are masked

    nq, nkv = sqp // qb, skp // kvb
    offs = jnp.reshape(causal_offset, (1,)).astype(jnp.int32)

    def q_map(bh, qi, kv, offs):
        return (bh, qi, 0)

    def kv_map(bh, qi, kv, offs):
        if is_causal:
            # Clamp so above-diagonal iterations re-use the already-resident
            # K/V block instead of streaming dead data from HBM.
            last_needed = (qi * qb + offs[0] + qb - 1) // kvb
            kv = jnp.minimum(kv, last_needed)
        return (bh, kv, 0)

    def mask_map(bh, qi, kv, offs):
        return (bh // H, 0, kv)

    kernel = functools.partial(
        _mla_attn_kernel, scale=scale, is_causal=is_causal,
        q_block=qb, kv_block=kvb,
        approx_recip=(jnp.dtype(lv_hm.dtype) != jnp.dtype(jnp.float32)))

    out = pl.pallas_call(
        kernel,
        out_shape=jax.ShapeDtypeStruct((BH, sqp, L), lv_hm.dtype),
        grid_spec=pltpu.PrefetchScalarGridSpec(
            num_scalar_prefetch=1,
            grid=(BH, nq, nkv),
            in_specs=[
                pl.BlockSpec((1, qb, L), q_map),
                pl.BlockSpec((1, kvb, L), kv_map),
                pl.BlockSpec((1, kvb, L), kv_map),
                pl.BlockSpec((1, 1, kvb), mask_map),
            ],
            out_specs=pl.BlockSpec((1, qb, L), q_map),
            scratch_shapes=[
                pltpu.VMEM((qb, 1), jnp.float32),    # running row max
                pltpu.VMEM((qb, 1), jnp.float32),    # running softmax denom
                pltpu.VMEM((qb, L), jnp.float32),    # weighted-latent accum
            ],
        ),
        compiler_params=pltpu.CompilerParams(
            # (batch*head, q blocks) shard across TensorCores; kv is reduction.
            dimension_semantics=("parallel", "parallel", "arbitrary"),
            vmem_limit_bytes=_vmem_limit_bytes(),
        ),
    )(offs, q_hm, lk_hm, lv_hm, mask_i32)
    return out[:, :Sq, :]


# ----------------------------------------------------------------------------
# Parameters, one-time weight absorption, cache, and the module forward
# ----------------------------------------------------------------------------
def init_mla_params(key, *, dim_model, num_heads, dim_k, dim_v, latent_dim):
    """PyTorch-style uniform(-1/sqrt(fan_in), 1/sqrt(fan_in)) init."""
    def linear(k, dout, din, bias=True):
        kw, kb = jax.random.split(k)
        bound = 1.0 / math.sqrt(din)
        w = jax.random.uniform(kw, (dout, din), jnp.float32, -bound, bound)
        b = (jax.random.uniform(kb, (dout,), jnp.float32, -bound, bound)
             if bias else None)
        return w, b

    ks = jax.random.split(key, 6)
    p = {}
    p["q_w"], p["q_b"] = linear(ks[0], dim_k * num_heads, dim_model)
    p["lk_w"], p["lk_b"] = linear(ks[1], latent_dim * num_heads, dim_model)
    p["lv_w"], p["lv_b"] = linear(ks[2], latent_dim * num_heads, dim_model)
    p["krec_w"], _ = linear(ks[3], dim_k, latent_dim, bias=False)
    p["vrec_w"], _ = linear(ks[4], dim_v, latent_dim, bias=False)
    p["out_w"], p["out_b"] = linear(ks[5], dim_model, dim_v * num_heads)
    return p


def prepare_mla_weights(params, *, num_heads, dim_k, dim_v, latent_dim,
                        dim_model, compute_dtype=jnp.float32):
    """One-time weight absorption + dtype cast (done at init time, not per call).
    q·Wk·lkᵀ == (q·Wk)·lkᵀ folds k_reconstruction into the query projection and
    (p·lv)·Wvᵀ folds v_reconstruction into linear_out (exact reassociation)."""
    H, L, Dm = num_heads, latent_dim, dim_model
    qw = params["q_w"].reshape(H, dim_k, Dm)
    qb = params["q_b"].reshape(H, dim_k)
    krec = params["krec_w"]                           # (dk, L)
    w_qlat = jnp.einsum("hkd,kl->hld", qw, krec).reshape(H * L, Dm)
    b_qlat = jnp.einsum("hk,kl->hl", qb, krec).reshape(H * L)
    ow = params["out_w"].reshape(Dm, H, dim_v)
    vrec = params["vrec_w"]                           # (dv, L)
    w_out = jnp.einsum("dhj,jl->dhl", ow, vrec).reshape(Dm, H * L)
    cd = compute_dtype
    return {
        "w_qlat": w_qlat.astype(cd), "b_qlat": b_qlat,
        "w_lk": params["lk_w"].astype(cd), "b_lk": params["lk_b"],
        "w_lv": params["lv_w"].astype(cd), "b_lv": params["lv_b"],
        "w_out": w_out.astype(cd), "b_out": params["out_b"],
    }


def init_mla_cache(batch, max_seq_len, *, num_heads, latent_dim,
                   dtype=jnp.float32):
    """Preallocated latent-KV cache, head-major (B, H, S, L) like the PyTorch
    module's cache, updated in place each step (no O(Sk) concat per token)."""
    shape = (batch, num_heads, max_seq_len, latent_dim)
    return {"latent_k": jnp.zeros(shape, dtype),
            "latent_v": jnp.zeros(shape, dtype),
            "length": jnp.zeros((), jnp.int32)}


def multi_latent_attention_forward(prepared, queries, keys, values, *,
                                   num_heads, dim_k, dim_v, latent_dim,
                                   is_causal, mask=None, kv_cache=None,
                                   compute_dtype=jnp.float32,
                                   q_block=256, kv_block=512):
    B, Sq, Dm = queries.shape
    Sk_new = keys.shape[1]
    H, L = num_heads, latent_dim
    cd = compute_dtype

    # Projections: bf16 operands are produced once here (out_dtype=cd), not
    # re-cast per kv step inside the attention kernel.
    q_lat = pallas_linear(queries.reshape(B * Sq, Dm).astype(cd),
                          prepared["w_qlat"], prepared["b_qlat"], out_dtype=cd)
    lk_new = pallas_linear(keys.reshape(B * Sk_new, Dm).astype(cd),
                           prepared["w_lk"], prepared["b_lk"], out_dtype=cd)
    lv_new = pallas_linear(values.reshape(B * Sk_new, Dm).astype(cd),
                           prepared["w_lv"], prepared["b_lv"], out_dtype=cd)

    # Head-major (B, H, S, L): contiguous per-head tiles for the attention
    # kernel (layout plumbing in the wrapper instead of XLU shuffles per block).
    q_hm = q_lat.reshape(B, Sq, H, L).transpose(0, 2, 1, 3)
    lk_new = lk_new.reshape(B, Sk_new, H, L).transpose(0, 2, 1, 3)
    lv_new = lv_new.reshape(B, Sk_new, H, L).transpose(0, 2, 1, 3)

    new_cache = None
    causal_offset = jnp.zeros((), jnp.int32)
    if kv_cache is not None:
        cur_len = kv_cache["length"].astype(jnp.int32)
        latent_k = lax.dynamic_update_slice(
            kv_cache["latent_k"], lk_new.astype(kv_cache["latent_k"].dtype),
            (0, 0, cur_len, 0))
        latent_v = lax.dynamic_update_slice(
            kv_cache["latent_v"], lv_new.astype(kv_cache["latent_v"].dtype),
            (0, 0, cur_len, 0))
        new_len = cur_len + Sk_new
        new_cache = {"latent_k": latent_k, "latent_v": latent_v,
                     "length": new_len}
        valid_len = new_len
        # NOTE: the PyTorch module builds its causal mask from *local* query
        # indices even with a cache (which would mask valid cached keys); we
        # offset query positions by the cached length (standard decode form).
        causal_offset = cur_len
    else:
        latent_k, latent_v = lk_new, lv_new
        valid_len = Sk_new

    Sk_tot = latent_k.shape[2]
    pos = jnp.arange(Sk_tot, dtype=jnp.int32)
    key_invalid = jnp.broadcast_to(pos[None, :] >= valid_len, (B, Sk_tot))
    if mask is not None:
        user = mask.astype(bool).reshape(B, -1)
        if user.shape[1] != Sk_tot:
            raise ValueError(f"mask must cover {Sk_tot} keys, got {user.shape[1]}")
        key_invalid = key_invalid | user
    mask_i32 = key_invalid.astype(jnp.int32).reshape(B, 1, Sk_tot)

    scale = 1.0 / math.sqrt(float(dim_k))
    ctx = pallas_mla_attention_core(
        q_hm.reshape(B * H, Sq, L),
        latent_k.astype(cd).reshape(B * H, Sk_tot, L),
        latent_v.astype(cd).reshape(B * H, Sk_tot, L),
        mask_i32, causal_offset,
        num_heads=H, scale=scale, is_causal=is_causal,
        q_block=q_block, kv_block=kv_block)

    # Back to flat-head layout for the absorbed output projection.
    ctx = ctx.reshape(B, H, Sq, L).transpose(0, 2, 1, 3).reshape(B * Sq, H * L)
    out = pallas_linear(ctx, prepared["w_out"], prepared["b_out"],
                        out_dtype=jnp.float32).reshape(B, Sq, Dm)
    return out, new_cache


# ----------------------------------------------------------------------------
# Pure-JAX reference mirroring the PyTorch module (non-absorbed form)
# ----------------------------------------------------------------------------
def reference_forward(params, queries, keys, values, *, num_heads, dim_k, dim_v,
                      latent_dim, is_causal, mask=None):
    B, Sq, Dm = queries.shape
    Sk = keys.shape[1]
    H, L = num_heads, latent_dim
    q = (queries @ params["q_w"].T + params["q_b"]).reshape(B, Sq, H, dim_k)
    q = q.transpose(0, 2, 1, 3)
    lk = (keys @ params["lk_w"].T + params["lk_b"]).reshape(B, Sk, H, L)
    lk = lk.transpose(0, 2, 1, 3)
    lv = (values @ params["lv_w"].T + params["lv_b"]).reshape(B, Sk, H, L)
    lv = lv.transpose(0, 2, 1, 3)
    k = lk @ params["krec_w"].T
    v = lv @ params["vrec_w"].T
    scores = jnp.einsum("bhqd,bhkd->bhqk", q, k) / (dim_k ** 0.5)
    if mask is not None:
        scores = jnp.where(mask[:, None, None, :], -jnp.inf, scores)
    if is_causal:
        cm = jnp.triu(jnp.ones((Sq, Sk), bool), k=1)
        scores = jnp.where(cm[None, None], -jnp.inf, scores)
    attn = jax.nn.softmax(scores, axis=-1)
    out = jnp.einsum("bhqk,bhkd->bhqd", attn, v)
    out = out.transpose(0, 2, 1, 3).reshape(B, Sq, H * dim_v)
    return out @ params["out_w"].T + params["out_b"]


# ----------------------------------------------------------------------------
if __name__ == "__main__":
    B, Sq, Sk = 2, 8, 8
    dim_model, num_heads, dim_k, dim_v, latent_dim = 32, 4, 16, 16, 8

    key = jax.random.PRNGKey(0)
    kp, kq, kk, kvv, kq2, kk2, kv2 = jax.random.split(key, 7)
    params = init_mla_params(kp, dim_model=dim_model, num_heads=num_heads,
                             dim_k=dim_k, dim_v=dim_v, latent_dim=latent_dim)
    queries = jax.random.normal(kq, (B, Sq, dim_model), jnp.float32)
    keys = jax.random.normal(kk, (B, Sk, dim_model), jnp.float32)
    values = jax.random.normal(kvv, (B, Sk, dim_model), jnp.float32)

    dims = dict(num_heads=num_heads, dim_k=dim_k, dim_v=dim_v,
                latent_dim=latent_dim)
    prep_f32 = prepare_mla_weights(params, dim_model=dim_model,
                                   compute_dtype=jnp.float32, **dims)

    # 1) causal, no mask, f32 compute.
    out, _ = multi_latent_attention_forward(
        prep_f32, queries, keys, values, is_causal=True, mask=None,
        kv_cache=None, compute_dtype=jnp.float32, **dims)
    out = jax.block_until_ready(out)
    ref = reference_forward(params, queries, keys, values,
                            is_causal=True, mask=None, **dims)
    assert out.shape == (B, Sq, dim_model)
    assert jnp.allclose(out, ref, rtol=3e-2, atol=3e-2), "causal f32 mismatch"

    # 2) non-causal with a key padding mask.
    pad_mask = jnp.zeros((B, Sk), bool).at[0, -2:].set(True)
    out_m, _ = multi_latent_attention_forward(
        prep_f32, queries, keys, values, is_causal=False, mask=pad_mask,
        kv_cache=None, compute_dtype=jnp.float32, **dims)
    out_m = jax.block_until_ready(out_m)
    ref_m = reference_forward(params, queries, keys, values,
                              is_causal=False, mask=pad_mask, **dims)
    assert jnp.allclose(out_m, ref_m, rtol=3e-2, atol=3e-2), "masked mismatch"

    # 3) preallocated latent-KV cache: causal prefill + one causal decode step.
    q_new = jax.random.normal(kq2, (B, 1, dim_model), jnp.float32)
    k_new = jax.random.normal(kk2, (B, 1, dim_model), jnp.float32)
    v_new = jax.random.normal(kv2, (B, 1, dim_model), jnp.float32)
    cache = init_mla_cache(B, Sk + 1, num_heads=num_heads,
                           latent_dim=latent_dim, dtype=jnp.float32)
    out_pre, cache = multi_latent_attention_forward(
        prep_f32, queries, keys, values, is_causal=True, mask=None,
        kv_cache=cache, compute_dtype=jnp.float32, **dims)
    out_pre = jax.block_until_ready(out_pre)
    assert jnp.allclose(out_pre, ref, rtol=3e-2, atol=3e-2), "prefill mismatch"
    out_dec, cache = multi_latent_attention_forward(
        prep_f32, q_new, k_new, v_new, is_causal=True, mask=None,
        kv_cache=cache, compute_dtype=jnp.float32, **dims)
    out_dec = jax.block_until_ready(out_dec)
    ref_full = reference_forward(
        params, jnp.concatenate([queries, q_new], axis=1),
        jnp.concatenate([keys, k_new], axis=1),
        jnp.concatenate([values, v_new], axis=1),
        is_causal=True, mask=None, **dims)
    assert int(cache["length"]) == Sk + 1
    assert cache["latent_k"].shape == (B, num_heads, Sk + 1, latent_dim)
    assert jnp.allclose(out_dec, ref_full[:, -1:], rtol=3e-2, atol=3e-2), \
        "decode mismatch"

    # 4) bf16 operands + bf16 latent streams (f32 accumulation and softmax).
    prep_bf16 = prepare_mla_weights(params, dim_model=dim_model,
                                    compute_dtype=jnp.bfloat16, **dims)
    out_bf16, _ = multi_latent_attention_forward(
        prep_bf16, queries, keys, values, is_causal=True, mask=None,
        kv_cache=None, compute_dtype=jnp.bfloat16, **dims)
    out_bf16 = jax.block_until_ready(out_bf16)
    assert jnp.allclose(out_bf16, ref, rtol=1e-1, atol=1e-1), "bf16 mismatch"

    print("KERNEL_OK")
</pallas_src>

<mosaic_0001>
module attributes {stable_mosaic.version = 11 : i64} {
  func.func @_linear_kernel(%arg0: i32, %arg1: i32, %arg2: i32, %arg3: memref<16x128xf32, #tpu.memory_space<vmem>>, %arg4: memref<128x128xf32, #tpu.memory_space<vmem>>, %arg5: memref<1x128xf32, #tpu.memory_space<vmem>>, %arg6: memref<16x128xf32, #tpu.memory_space<vmem>>, %arg7: memref<16x128xf32, #tpu.memory_space<vmem>>) attributes {dimension_semantics = [#tpu.dimension_semantics<parallel>, #tpu.dimension_semantics<parallel>, #tpu.dimension_semantics<arbitrary>], iteration_bounds = array<i64: 1, 1, 1>, scalar_prefetch = 0 : i64, scratch_operands = 1 : i64, tpu.core_type = #tpu.core_type<tc>, window_params = [{transform_indices = @transform_0, window_bounds = array<i64: 16, 128>}, {transform_indices = @transform_1, window_bounds = array<i64: 128, 128>}, {transform_indices = @transform_2, window_bounds = array<i64: 1, 128>}, {transform_indices = @transform_3, window_bounds = array<i64: 16, 128>}]} {
    %c0_i32 = arith.constant 0 : i32
    %0 = arith.cmpi eq, %arg2, %c0_i32 : i32
    %1 = arith.extui %0 : i1 to i32
    %c0_i32_0 = arith.constant 0 : i32
    %2 = arith.cmpi ne, %1, %c0_i32_0 : i32
    scf.if %2 {
      %cst_10 = arith.constant 0.000000e+00 : f32
      %12 = vector.broadcast %cst_10 : f32 to vector<16x128xf32>
      %c0_11 = arith.constant 0 : index
      %c0_12 = arith.constant 0 : index
      %13 = vector.load %arg7[%c0_11, %c0_12] : memref<16x128xf32, #tpu.memory_space<vmem>>, vector<16x128xf32>
      tpu.vector_store %arg7[%c0_11, %c0_12], %12 {strides = array<i32>} : memref<16x128xf32, #tpu.memory_space<vmem>>, vector<16x128xf32>,
    } else {
    }
    %c0 = arith.constant 0 : index
    %c0_1 = arith.constant 0 : index
    %3 = vector.load %arg7[%c0, %c0_1] : memref<16x128xf32, #tpu.memory_space<vmem>>, vector<16x128xf32>
    %c0_2 = arith.constant 0 : index
    %c0_3 = arith.constant 0 : index
    %4 = vector.load %arg3[%c0_2, %c0_3] : memref<16x128xf32, #tpu.memory_space<vmem>>, vector<16x128xf32>
    %c0_4 = arith.constant 0 : index
    %c0_5 = arith.constant 0 : index
    %5 = vector.load %arg4[%c0_4, %c0_5] : memref<128x128xf32, #tpu.memory_space<vmem>>, vector<128x128xf32>
    %cst = arith.constant dense<0.000000e+00> : vector<16x128xf32>
    %6 = tpu.matmul %4, %5, %cst {dimension_numbers = #tpu.dot_dimension_numbers<[1], [1], [0], [0], [0, 0, 1, 0], [], []>} : vector<16x128xf32>, vector<128x128xf32>, vector<16x128xf32> -> vector<16x128xf32>
    %7 = arith.addf %3, %6 : vector<16x128xf32>
    %c0_6 = arith.constant 0 : index
    %c0_7 = arith.constant 0 : index
    %8 = vector.load %arg7[%c0_6, %c0_7] : memref<16x128xf32, #tpu.memory_space<vmem>>, vector<16x128xf32>
    tpu.vector_store %arg7[%c0_6, %c0_7], %7 {strides = array<i32>} : memref<16x128xf32, #tpu.memory_space<vmem>>, vector<16x128xf32>,
    %c0_i32_8 = arith.constant 0 : i32
    %9 = arith.cmpi eq, %arg2, %c0_i32_8 : i32
    %10 = arith.extui %9 : i1 to i32
    %c0_i32_9 = arith.constant 0 : i32
    %11 = arith.cmpi ne, %10, %c0_i32_9 : i32
    scf.if %11 {
      %c0_10 = arith.constant 0 : index
      %c0_11 = arith.constant 0 : index
      %12 = vector.load %arg7[%c0_10, %c0_11] : memref<16x128xf32, #tpu.memory_space<vmem>>, vector<16x128xf32>
      %c0_12 = arith.constant 0 : index
      %c0_13 = arith.constant 0 : index
      %13 = vector.load %arg5[%c0_12, %c0_13] : memref<1x128xf32, #tpu.memory_space<vmem>>, vector<1x128xf32>
      %14 = vector.broadcast %13 : vector<1x128xf32> to vector<16x128xf32>
      %15 = arith.addf %12, %14 : vector<16x128xf32>
      %c0_14 = arith.constant 0 : index
      %c0_15 = arith.constant 0 : index
      %16 = vector.load %arg6[%c0_14, %c0_15] : memref<16x128xf32, #tpu.memory_space<vmem>>, vector<16x128xf32>
      tpu.vector_store %arg6[%c0_14, %c0_15], %15 {strides = array<i32>} : memref<16x128xf32, #tpu.memory_space<vmem>>, vector<16x128xf32>,
    } else {
    }
    return
  }
  func.func @transform_0(%arg0: i32, %arg1: i32, %arg2: i32) -> (i32, i32) {
    %c0_i32 = arith.constant 0 : i32
    return %arg0, %arg2 : i32, i32
  }
  func.func @transform_1(%arg0: i32, %arg1: i32, %arg2: i32) -> (i32, i32) {
    %c0_i32 = arith.constant 0 : i32
    return %arg1, %arg2 : i32, i32
  }
  func.func @transform_2(%arg0: i32, %arg1: i32, %arg2: i32) -> (i32, i32) {
    %c0_i32 = arith.constant 0 : i32
    %c0_i32_0 = arith.constant 0 : i32
    return %c0_i32, %arg1 : i32, i32
  }
  func.func @transform_3(%arg0: i32, %arg1: i32, %arg2: i32) -> (i32, i32) {
    %c0_i32 = arith.constant 0 : i32
    return %arg0, %arg1 : i32, i32
  }
}

</mosaic_0001>

<bundles_post_ra>
// kernel: tpu_custom_call.1
= control target key start
LH: loop header
LB: loop body
LE: loop exit
PB: predicated region body
PF: predicated region fallthrough
CT: control target
= control target key end

     0   :  { %8 = vsyncpa [#allocation4], 0  ;;  %s353_s0 = inlined_call_operand.hbm [shape: f32[16,128], index: 0, kind: input, shape index: {}]   ;;  %s354_s1 = inlined_call_operand.hbm [shape: f32[128,128], index: 1, kind: input, shape index: {}]   ;;  %s355_s2 = inlined_call_operand.vmem [shape: f32[1,128], index: 2, kind: input, shape index: {}]   ;;  %s356_s3 = inlined_call_operand.hbm [shape: f32[16,128], index: 3, kind: output, shape index: {}]  }
   0x1   :  { %9 = vsyncpa [#allocation7], 0 }
   0x2   :  { %10 = vsyncpa [#allocation5], 0  ;;  %s307_s12 = smov [#allocation3]  }
   0x3   :  { %s16_s13 = sshll.u32 %s307_s12, 4  ;;  %s17_s13 = int_to_ptr.vmem [resolvable:$true] %s16_s13 }
   0x4   :  { %s249_s14 = scalar_lea.vmem %s17_s13, 256  ;;  %p254_p1 = scmp.lt.s32.totalorder %s17_s13, %s17_s13 }
   0x5   :  { %p250_p0 = scmp.ne.s32.totalorder %s17_s13, %s249_s14  ;;  %p255_p2 = scmp.lt.s32.totalorder %s249_s14, %s249_s14 }
   0x7   :  { %p256_p3 = por %p255_p2, %p254_p1 }
   0x9   :  { %p257_p4 = pnand %p256_p3, %p250_p0 }
   0xb   :  { %260 = shalt.err (!%p257_p4)
}
   0xc   :  { %s308_s15 = smov 128   ;;  %s309_s16 = smov 8  }
   0xd   :  { %22 = dma.hbm_to_vmem [thread:$0]  %s353_s0, 256, %s17_s13, [#allocation4], %s308_s15, %s308_s15, %s309_s16  }
   0xe   :  { %s310_s19 = smov [#allocation6]  }
   0xf   :  { %s28_s20 = sshll.u32 %s310_s19, 4  ;;  %s29_s20 = int_to_ptr.vmem [resolvable:$true] %s28_s20 }
  0x10   :  { %s269_s21 = scalar_lea.vmem %s29_s20, 2048  ;;  %p274_p6 = scmp.lt.s32.totalorder %s29_s20, %s29_s20 }
  0x11   :  { %p270_p5 = scmp.ne.s32.totalorder %s29_s20, %s269_s21  ;;  %p275_p7 = scmp.lt.s32.totalorder %s269_s21, %s269_s21 }
  0x13   :  { %p276_p8 = por %p275_p7, %p274_p6 }
  0x15   :  { %p277_p9 = pnand %p276_p8, %p270_p5 }
  0x17   :  { %280 = shalt.err (!%p277_p9)
}
  0x18   :  { %34 = dma.hbm_to_vmem [thread:$0]  %s354_s1, 2048, %s29_s20, [#allocation7], %s308_s15, %s308_s15, %s309_s16  }
  0x19   :  { %301 = dma.done.wait [#allocation4], 256  }
  0x1a   :  { %302 = vsyncadd [#allocation4], 4294967040 }
  0x1b   :  { %303 = dma.done.wait [#allocation7], 2048  }
  0x1c   :  { %304 = vsyncadd [#allocation7], 4294965248  ;;  %v68_v0 = vld [vmem:[#allocation6 + $0x78] sm:$0xff]  ;;  %v67_v1 = vld [vmem:[#allocation6 + $0x70] sm:$0xff]  ;;  %s311_s24 = smov [#allocation8]  }
  0x1d   :  { %201 = vmatprep.subr.mxu0 %v68_v0  ;;  %v66_v2 = vld [vmem:[#allocation6 + $0x68] sm:$0xff]  ;;  %v51_v3 = vld [vmem:[#allocation3] sm:$0xff]  ;;  %v65_v4 = vld [vmem:[#allocation6 + $0x60] sm:$0xff]  ;;  %s169_s25 = sshll.u32 %s311_s24, 4  ;;  %s170_s25 = int_to_ptr.vmem [resolvable:$true] %s169_s25 }
  0x1e   :  { %202 = vmatpush3.xpose.msra.mxu0 %v68_v0  ;;  %233 = vmatprep.mubr.f32.mxu0 %v51_v3  ;;  %v64_v5 = vld [vmem:[#allocation6 + $0x58] sm:$0xff]  ;;  %v63_v6 = vld [vmem:[#allocation6 + $0x50] sm:$0xff]  ;;  %v62_v7 = vld [vmem:[#allocation6 + $0x48] sm:$0xff]  ;;  %s281_s26 = scalar_lea.vmem %s170_s25, 256  ;;  %p286_p11 = scmp.lt.s32.totalorder %s170_s25, %s170_s25 }
  0x1f   :  { %203 = vmatprep.subr.mxu0 %v67_v1  ;;  %v61_v8 = vld [vmem:[#allocation6 + $0x40] sm:$0xff]  ;;  %v60_v9 = vld [vmem:[#allocation6 + $0x38] sm:$0xff]  ;;  %v59_v10 = vld [vmem:[#allocation6 + $0x30] sm:$0xff]  ;;  %p282_p10 = scmp.ne.s32.totalorder %s170_s25, %s281_s26  ;;  %p287_p12 = scmp.lt.s32.totalorder %s281_s26, %s281_s26 }
  0x20   :  { %v58_v11 = vld [vmem:[#allocation6 + $0x28] sm:$0xff]  ;;  %v57_v12 = vld [vmem:[#allocation6 + $0x20] sm:$0xff]  ;;  %v56_v13 = vld [vmem:[#allocation6 + $0x18] sm:$0xff] }
  0x21   :  { %v55_v14 = vld [vmem:[#allocation6 + $0x10] sm:$0xff]  ;;  %v54_v15 = vld [vmem:[#allocation6 + $0x8] sm:$0xff]  ;;  %v53_v16 = vld [vmem:[#allocation6] sm:$0xff]  ;;  %p288_p13 = por %p287_p12, %p286_p11 }
  0x22   :  { %204 = vmatpush3.xpose.msra.mxu0 %v67_v1  ;;  %v52_v17 = vld [vmem:[#allocation3 + $0x8] sm:$0xff]  ;;  %v182_v18 = vld [vmem:[%s355_s2] ss:$0 sm:$0xff] }
  0x23   :  { %205 = vmatprep.subr.mxu0 %v66_v2  ;;  %p289_p0 = pnand %p288_p13, %p282_p10 }
  0x26   :  { %206 = vmatpush3.xpose.msra.mxu0 %v66_v2 }
  0x27   :  { %207 = vmatprep.subr.mxu0 %v65_v4 }
  0x2a   :  { %208 = vmatpush3.xpose.msra.mxu0 %v65_v4 }
  0x2b   :  { %209 = vmatprep.subr.mxu0 %v64_v5 }
  0x2e   :  { %210 = vmatpush3.xpose.msra.mxu0 %v64_v5 }
  0x2f   :  { %211 = vmatprep.subr.mxu0 %v63_v6 }
  0x32   :  { %212 = vmatpush3.xpose.msra.mxu0 %v63_v6 }
  0x33   :  { %213 = vmatprep.subr.mxu0 %v62_v7 }
  0x36   :  { %214 = vmatpush3.xpose.msra.mxu0 %v62_v7 }
  0x37   :  { %215 = vmatprep.subr.mxu0 %v61_v8 }
  0x3a   :  { %216 = vmatpush3.xpose.msra.mxu0 %v61_v8 }
  0x3b   :  { %217 = vmatprep.subr.mxu0 %v60_v9 }
  0x3e   :  { %218 = vmatpush3.xpose.msra.mxu0 %v60_v9 }
  0x3f   :  { %219 = vmatprep.subr.mxu0 %v59_v10 }
  0x42   :  { %220 = vmatpush3.xpose.msra.mxu0 %v59_v10 }
  0x43   :  { %221 = vmatprep.subr.mxu0 %v58_v11 }
  0x46   :  { %222 = vmatpush3.xpose.msra.mxu0 %v58_v11 }
  0x47   :  { %223 = vmatprep.subr.mxu0 %v57_v12 }
  0x4a   :  { %224 = vmatpush3.xpose.msra.mxu0 %v57_v12 }
  0x4b   :  { %225 = vmatprep.subr.mxu0 %v56_v13 }
  0x4e   :  { %226 = vmatpush3.xpose.msra.mxu0 %v56_v13 }
  0x4f   :  { %227 = vmatprep.subr.mxu0 %v55_v14 }
  0x52   :  { %228 = vmatpush3.xpose.msra.mxu0 %v55_v14 }
  0x53   :  { %229 = vmatprep.subr.mxu0 %v54_v15 }
  0x56   :  { %230 = vmatpush3.xpose.msra.mxu0 %v54_v15 }
  0x57   :  { %231 = vmatprep.subr.mxu0 %v53_v16 }
  0x5a   :  { %232 = vmatpush3.xpose.msra.mxu0 %v53_v16 }
  0x5d   :  { %234 = vmatmul.mubr.f32.vlgmr.msra.gmra.mxu0 %v52_v17 }
 0x11d   :  { %v235_v19 = vpop.f32.mrf.mxu0 }
 0x11e   :  { %v161_v20 = vadd.f32 %v235_v19, %v182_v18 }
 0x11f   :  { %v135_v21 = vpop.f32.mrf.mxu0 }
 0x120   :  { %163 = vst [vmem:[#allocation8 + $0x8] sm:$0xff] %v161_v20  ;;  %v160_v22 = vadd.f32 %v182_v18, %v135_v21 }
 0x122   :  { %162 = vst [vmem:[#allocation8] sm:$0xff] %v160_v22 }
 0x123   :  { %292 = shalt.err (!%p289_p0)
}
 0x124   :  { %175 = dma.vmem_to_hbm [thread:$0]  %s170_s25, 256, %s356_s3, [#allocation5], %s308_s15, %s308_s15, %s309_s16  }
 0x125   :  { %305 = dma.done.wait [#allocation5], 256  }
 0x126   :  { %306 = vsyncadd [#allocation5], 4294967040 }
 0x127   :  { %179 = vsyncpa [#allocation4], 1 }
 0x128   :  { %180 = vsyncpa [#allocation7], 1 }
 0x129   :  { %181 = vsyncpa [#allocation5], 1 }

</bundles_post_ra>
